<compile_context>
chip_gen: v6e
topology: v6e:2x2x1
jax: 0.10.0
libtpu: 0.0.40
codegen_flags: <defaults>
</compile_context>

<pallas_src>
import functools

import jax
import jax.numpy as jnp
from jax.experimental import pallas as pl
from jax.experimental.pallas import tpu as pltpu


def _round_up(x, m):
    return ((x + m - 1) // m) * m


def _visual_attention_kernel(img_ref, hemb_ref, wimg_ref, watt_ref, out_ref,
                             *, n_valid):
    TB, N, D_img = img_ref.shape
    H = wimg_ref.shape[1]

    img3 = img_ref[...]                                     # (TB, N, D_img)
    # Free view: the wrapper pads N to the sublane pack of img3.dtype
    # (8 rows for f32, 16 for bf16, 32 for 8-bit types).
    img2 = img3.reshape(TB * N, D_img)

    # Region projection: one big MXU matmul for the whole batch block.
    emb2 = jnp.dot(img2, wimg_ref[...],
                   preferred_element_type=jnp.float32)      # (TB*N, H) f32
    emb3 = emb2.reshape(TB, N, H)

    # Add the (hoisted) LSTM projection and apply tanh (f32 on the EUP).
    act3 = jnp.tanh(emb3 + hemb_ref[...][:, None, :])       # (TB, N, H) f32

    # Attention logits, lane-dense: (TB, N) with regions on the lane axis.
    # The linear_attention bias is a constant shift -> cancels in the softmax.
    logits = jnp.sum(act3 * watt_ref[...].reshape(1, 1, H), axis=-1)  # (TB, N)

    if n_valid != N:  # static branch: mask zero-padded regions
        lane = jax.lax.broadcasted_iota(jnp.int32, (TB, N), 1)
        logits = jnp.where(lane < n_valid, logits, -1e30)

    # Softmax over regions (lane reductions); divide goes to the EUP.
    m = jnp.max(logits, axis=-1, keepdims=True)
    e = jnp.exp(logits - m)
    denom = jnp.sum(e, axis=-1, keepdims=True)
    attn = e * pl.reciprocal(denom, approx=True)            # (TB, N) f32

    # Weighted sum of image features: VPU multiply + region (sublane) reduce.
    # attn stays f32; bf16 image features promote to f32 in the multiply.
    weighted = attn[:, :, None] * img3                      # (TB, N, D_img) f32
    out_ref[...] = jnp.sum(weighted, axis=1).astype(out_ref.dtype)


def _vmem_capacity_bytes():
    try:
        return int(pltpu.get_tpu_info().vmem_capacity_bytes)
    except Exception:
        return 64 * 1024 * 1024   # conservative (v7x per-TensorCore)


def visual_attention(image_features, h1, w_img, w_lstm, w_att, b_att,
                     *, batch_tile=None, compute_dtype=jnp.bfloat16):
    """
    image_features: (B, N, D_img) f32
    h1:             (B, D_lstm)   f32
    w_img:  (H, D_img)   linear_image_features.weight (PyTorch layout, no bias)
    w_lstm: (H, D_lstm)  linear_att_lstm.weight (no bias)
    w_att:  (1, H)       linear_attention.weight
    b_att:  (1,)         linear_attention.bias (softmax-invariant, unused)
    returns (B, D_img) f32
    """
    B, N, D_img = image_features.shape
    H = w_img.shape[0]
    del b_att  # constant logit shift; cancels in the softmax

    # Hoisted out of the kernel: the h1 projection as one dense matmul.
    h_emb = jnp.dot(h1.astype(jnp.float32),
                    jnp.transpose(w_lstm).astype(jnp.float32))        # (B, H)

    w_img_t = jnp.transpose(w_img).astype(compute_dtype)              # (D_img, H)
    w_att_row = w_att.reshape(1, H).astype(jnp.float32)               # (1, H)
    img = image_features.astype(compute_dtype)

    # Pad regions to the dtype-dependent sublane pack so (TB,N,D)->(TB*N,D)
    # stays a free view (8 for f32, 16 for bf16, 32 for 8-bit dtypes).
    isz = jnp.dtype(compute_dtype).itemsize
    n_align = 8 * max(1, 4 // isz)
    N_pad = _round_up(N, n_align)
    if N_pad != N:
        img = jnp.pad(img, ((0, 0), (0, N_pad - N), (0, 0)))

    # --- Batch-tile sizing against a generation-aware VMEM budget ----------
    def vmem_bytes(tb):
        return (2 * tb * N_pad * D_img * isz      # image block (double-buffered)
                + 2 * tb * H * 4                  # h_emb block (double-buffered)
                + 2 * tb * D_img * 4              # output block (double-buffered)
                + 2 * (D_img * H * isz + H * 4)   # weights (double-buffered)
                + 2 * tb * N_pad * H * 4          # emb3 + act3 live intermediates
                + tb * N_pad * D_img * 4)         # f32 weighted-sum intermediate

    vmem_cap = _vmem_capacity_bytes()             # 128 MiB v5e/v6e, 64 MiB v7x
    budget = int(0.70 * vmem_cap)

    tb_cap = 64 if batch_tile is None else max(8, _round_up(int(batch_tile), 8))
    TB = tb_cap
    while TB > 8 and vmem_bytes(TB) > budget:
        TB -= 8

    if B <= TB:
        # Single block covering the full batch (block == full array extent).
        TB, B_pad, grid_b = B, B, 1
    else:
        # Fix the block count first, then shrink TB to balance the blocks so
        # the tail block is never mostly padding.
        grid_b = -(-B // TB)
        TB = _round_up(-(-B // grid_b), 8)
        B_pad = grid_b * TB

    if B_pad != B:
        img = jnp.pad(img, ((0, B_pad - B), (0, 0), (0, 0)))
        h_emb = jnp.pad(h_emb, ((0, B_pad - B), (0, 0)))

    vmem_est = vmem_bytes(TB)
    vmem_limit = int(min(int(0.85 * vmem_cap),
                         max(int(1.3 * vmem_est), 32 * 1024 * 1024)))
    vmem_limit = min(max(vmem_limit, vmem_est), vmem_cap)

    grid_spec = pltpu.PrefetchScalarGridSpec(
        num_scalar_prefetch=0,
        grid=(grid_b,),
        in_specs=[
            pl.BlockSpec((TB, N_pad, D_img), lambda b: (b, 0, 0)),  # image feats
            pl.BlockSpec((TB, H), lambda b: (b, 0)),                # h1 @ W_lstm^T
            pl.BlockSpec((D_img, H), lambda b: (0, 0)),             # W_img^T (resident)
            pl.BlockSpec((1, H), lambda b: (0, 0)),                 # w_att row
        ],
        out_specs=pl.BlockSpec((TB, D_img), lambda b: (b, 0)),
    )

    out = pl.pallas_call(
        functools.partial(_visual_attention_kernel, n_valid=N),
        out_shape=jax.ShapeDtypeStruct((B_pad, D_img), jnp.float32),
        grid_spec=grid_spec,
        compiler_params=pltpu.CompilerParams(
            dimension_semantics=("parallel",),   # v7x: batch blocks over 2 TCs
            vmem_limit_bytes=vmem_limit),
    )(img, h_emb, w_img_t, w_att_row)

    return out[:B]


def visual_attention_ref(image_features, h1, w_img, w_lstm, w_att, b_att):
    """Pure-JAX reference mirroring the PyTorch forward (bias included)."""
    img_emb = jnp.einsum('bnd,hd->bnh', image_features, w_img)
    h_emb = jnp.einsum('bl,hl->bh', h1, w_lstm)[:, None, :]
    act = jnp.tanh(img_emb + h_emb)
    logits = jnp.einsum('bnh,oh->bno', act, w_att) + b_att          # (B, N, 1)
    attn = jax.nn.softmax(logits, axis=1)
    return jnp.sum(attn * image_features, axis=1)                   # (B, D_img)


if __name__ == "__main__":
    def make_inputs(key, B, N, D_img, D_lstm, H):
        ks = jax.random.split(key, 6)
        image_features = jax.random.normal(ks[0], (B, N, D_img), dtype=jnp.float32)
        h1 = jax.random.normal(ks[1], (B, D_lstm), dtype=jnp.float32)
        w_img = 0.1 * jax.random.normal(ks[2], (H, D_img), dtype=jnp.float32)
        w_lstm = 0.1 * jax.random.normal(ks[3], (H, D_lstm), dtype=jnp.float32)
        w_att = 0.1 * jax.random.normal(ks[4], (1, H), dtype=jnp.float32)
        b_att = 0.1 * jax.random.normal(ks[5], (1,), dtype=jnp.float32)
        return image_features, h1, w_img, w_lstm, w_att, b_att

    key = jax.random.PRNGKey(0)
    k1, k2 = jax.random.split(key)

    # 1) Small single-block case, default bf16 streaming (N=8 -> padded to 16).
    args = make_inputs(k1, B=4, N=8, D_img=128, D_lstm=32, H=64)
    out = jax.block_until_ready(visual_attention(*args))
    ref = visual_attention_ref(*args)
    assert out.shape == (4, 128)
    assert jnp.allclose(out, ref, atol=5e-2, rtol=5e-2), "bf16 small case mismatch"

    # 2) Multi-block grid with batch + region padding
    #    (B=20, batch_tile=8 -> 3 blocks of TB=8, B_pad=24; N=12 -> 16 masked).
    args = make_inputs(k2, B=20, N=12, D_img=128, D_lstm=32, H=64)
    out = jax.block_until_ready(visual_attention(*args, batch_tile=8))
    ref = visual_attention_ref(*args)
    assert out.shape == (20, 128)
    assert jnp.allclose(out, ref, atol=5e-2, rtol=5e-2), "bf16 padded case mismatch"

    # 3) f32 streaming path (tighter tolerance; approx reciprocal in softmax).
    out_f32 = jax.block_until_ready(
        visual_attention(*args, batch_tile=8, compute_dtype=jnp.float32))
    assert jnp.allclose(out_f32, ref, atol=1e-2, rtol=1e-2), "f32 case mismatch"

    print("KERNEL_OK")
</pallas_src>

<mosaic_0001>
module attributes {stable_mosaic.version = 11 : i64} {
  func.func @_visual_attention_kernel(%arg0: i32, %arg1: memref<4x16x128xbf16, #tpu.memory_space<vmem>>, %arg2: memref<4x64xf32, #tpu.memory_space<vmem>>, %arg3: memref<128x64xbf16, #tpu.memory_space<vmem>>, %arg4: memref<1x64xf32, #tpu.memory_space<vmem>>, %arg5: memref<4x128xf32, #tpu.memory_space<vmem>>) attributes {dimension_semantics = [#tpu.dimension_semantics<parallel>], iteration_bounds = array<i64: 1>, scalar_prefetch = 0 : i64, scratch_operands = 0 : i64, tpu.core_type = #tpu.core_type<tc>, window_params = [{transform_indices = @transform_0, window_bounds = array<i64: 4, 16, 128>}, {transform_indices = @transform_1, window_bounds = array<i64: 4, 64>}, {pipeline_mode = #tpu.pipeline_mode<synchronous>, transform_indices = @transform_2, window_bounds = array<i64: 128, 64>}, {pipeline_mode = #tpu.pipeline_mode<synchronous>, transform_indices = @transform_3, window_bounds = array<i64: 1, 64>}, {transform_indices = @transform_4, window_bounds = array<i64: 4, 128>}]} {
    %c0 = arith.constant 0 : index
    %c0_0 = arith.constant 0 : index
    %c0_1 = arith.constant 0 : index
    %0 = vector.load %arg1[%c0, %c0_0, %c0_1] : memref<4x16x128xbf16, #tpu.memory_space<vmem>>, vector<4x16x128xbf16>
    %1 = vector.shape_cast %0 : vector<4x16x128xbf16> to vector<64x128xbf16>
    %c0_2 = arith.constant 0 : index
    %c0_3 = arith.constant 0 : index
    %2 = vector.load %arg3[%c0_2, %c0_3] : memref<128x64xbf16, #tpu.memory_space<vmem>>, vector<128x64xbf16>
    %cst = arith.constant dense<0.000000e+00> : vector<64x64xf32>
    %3 = tpu.matmul %1, %2, %cst {dimension_numbers = #tpu.dot_dimension_numbers<[1], [0], [0], [1], [0, 0, 1, 1], [], []>} : vector<64x128xbf16>, vector<128x64xbf16>, vector<64x64xf32> -> vector<64x64xf32>
    %4 = vector.shape_cast %3 : vector<64x64xf32> to vector<4x16x64xf32>
    %c0_4 = arith.constant 0 : index
    %c0_5 = arith.constant 0 : index
    %5 = vector.load %arg2[%c0_4, %c0_5] : memref<4x64xf32, #tpu.memory_space<vmem>>, vector<4x64xf32>
    %6 = vector.shape_cast %5 : vector<4x64xf32> to vector<4x1x64xf32>
    %7 = vector.broadcast %6 : vector<4x1x64xf32> to vector<4x16x64xf32>
    %8 = arith.addf %4, %7 : vector<4x16x64xf32>
    %9 = math.tanh %8 : vector<4x16x64xf32>
    %c0_6 = arith.constant 0 : index
    %c0_7 = arith.constant 0 : index
    %10 = vector.load %arg4[%c0_6, %c0_7] : memref<1x64xf32, #tpu.memory_space<vmem>>, vector<1x64xf32>
    %11 = vector.shape_cast %10 : vector<1x64xf32> to vector<1x1x64xf32>
    %12 = vector.broadcast %11 : vector<1x1x64xf32> to vector<4x16x64xf32>
    %13 = arith.mulf %9, %12 : vector<4x16x64xf32>
    %cst_8 = arith.constant dense<0.000000e+00> : vector<4x16xf32>
    %14 = vector.multi_reduction <add>, %13, %cst_8 [2] : vector<4x16x64xf32> to vector<4x16xf32>
    %15 = tpu.iota {dimensions = array<i32: 1>} : vector<4x16xi32>
    %c8_i32 = arith.constant 8 : i32
    %16 = vector.broadcast %c8_i32 : i32 to vector<4x16xi32>
    %17 = arith.cmpi slt, %15, %16 : vector<4x16xi32>
    %cst_9 = arith.constant -1.000000e+30 : f32
    %18 = vector.broadcast %cst_9 : f32 to vector<4x16xf32>
    %19 = arith.select %17, %14, %18 : vector<4x16xi1>, vector<4x16xf32>
    %cst_10 = arith.constant dense<0xFF800000> : vector<4xf32>
    %20 = vector.multi_reduction <maximumf>, %19, %cst_10 [1] : vector<4x16xf32> to vector<4xf32>
    %21 = vector.shape_cast %20 : vector<4xf32> to vector<4x1xf32>
    %22 = vector.broadcast %21 : vector<4x1xf32> to vector<4x16xf32>
    %23 = arith.subf %19, %22 : vector<4x16xf32>
    %24 = math.exp %23 : vector<4x16xf32>
    %cst_11 = arith.constant dense<0.000000e+00> : vector<4xf32>
    %25 = vector.multi_reduction <add>, %24, %cst_11 [1] : vector<4x16xf32> to vector<4xf32>
    %26 = vector.shape_cast %25 : vector<4xf32> to vector<4x1xf32>
    %27 = tpu.reciprocal %26 {approx = true} : vector<4x1xf32> -> vector<4x1xf32>
    %28 = vector.broadcast %27 : vector<4x1xf32> to vector<4x16xf32>
    %29 = arith.mulf %24, %28 : vector<4x16xf32>
    %30 = vector.shape_cast %29 : vector<4x16xf32> to vector<4x16x1xf32>
    %31 = arith.extf %0 : vector<4x16x128xbf16> to vector<4x16x128xf32>
    %32 = vector.broadcast %30 : vector<4x16x1xf32> to vector<4x16x128xf32>
    %33 = arith.mulf %32, %31 : vector<4x16x128xf32>
    %cst_12 = arith.constant dense<0.000000e+00> : vector<4x128xf32>
    %34 = vector.multi_reduction <add>, %33, %cst_12 [1] : vector<4x16x128xf32> to vector<4x128xf32>
    %c0_13 = arith.constant 0 : index
    %c0_14 = arith.constant 0 : index
    %35 = vector.load %arg5[%c0_13, %c0_14] : memref<4x128xf32, #tpu.memory_space<vmem>>, vector<4x128xf32>
    tpu.vector_store %arg5[%c0_13, %c0_14], %34 {strides = array<i32>} : memref<4x128xf32, #tpu.memory_space<vmem>>, vector<4x128xf32>,
    return
  }
  func.func @transform_0(%arg0: i32) -> (i32, i32, i32) {
    %c0_i32 = arith.constant 0 : i32
    %c0_i32_0 = arith.constant 0 : i32
    %c0_i32_1 = arith.constant 0 : i32
    return %arg0, %c0_i32, %c0_i32_0 : i32, i32, i32
  }
  func.func @transform_1(%arg0: i32) -> (i32, i32) {
    %c0_i32 = arith.constant 0 : i32
    %c0_i32_0 = arith.constant 0 : i32
    return %arg0, %c0_i32 : i32, i32
  }
  func.func @transform_2(%arg0: i32) -> (i32, i32) {
    %c0_i32 = arith.constant 0 : i32
    %c0_i32_0 = arith.constant 0 : i32
    %c0_i32_1 = arith.constant 0 : i32
    return %c0_i32, %c0_i32_0 : i32, i32
  }
  func.func @transform_3(%arg0: i32) -> (i32, i32) {
    %c0_i32 = arith.constant 0 : i32
    %c0_i32_0 = arith.constant 0 : i32
    %c0_i32_1 = arith.constant 0 : i32
    return %c0_i32, %c0_i32_0 : i32, i32
  }
  func.func @transform_4(%arg0: i32) -> (i32, i32) {
    %c0_i32 = arith.constant 0 : i32
    %c0_i32_0 = arith.constant 0 : i32
    return %arg0, %c0_i32 : i32, i32
  }
}

</mosaic_0001>

<bundles_post_ra>
// kernel: tpu_custom_call.1
= control target key start
LH: loop header
LB: loop body
LE: loop exit
PB: predicated region body
PF: predicated region fallthrough
CT: control target
= control target key end

     0   :  { %s716_s0 = inlined_call_operand.vmem [shape: bf16[4,16,128], index: 0, kind: input, shape index: {}]   ;;  %s717_s1 = inlined_call_operand.vmem [shape: f32[4,64], index: 1, kind: input, shape index: {}]   ;;  %s718_s2 = inlined_call_operand.vmem [shape: bf16[128,64], index: 2, kind: input, shape index: {}]   ;;  %s719_s3 = inlined_call_operand.vmem [shape: f32[1,64], index: 3, kind: input, shape index: {}]   ;;  %s720_s4 = inlined_call_operand.hbm [shape: f32[4,128], index: 4, kind: output, shape index: {}]  }
   0x1   :  { %v530_v0 = vld [vmem:[%s718_s2 + $0x38] sm:$0xff]   ;;  %v531_v1 = vld [vmem:[%s718_s2 + $0x30] sm:$0xff]   ;;  %v532_v2 = vld [vmem:[%s718_s2 + $0x28] sm:$0xff]  }
   0x2   :  { %488 = vmatprep.subr.bf16.mxu0 %v530_v0  ;;  %512 = vmatprep.subr.bf16.mxu1 %v530_v0  ;;  %v533_v3 = vld [vmem:[%s718_s2 + $0x20] sm:$0xff]   ;;  %v635_v5 = vld [vmem:[%s716_s0 + $0x10] sm:$0xff]  }
   0x3   :  { %489 = vmatpush3.bf16.msra.mxu0 %v530_v0  ;;  %520 = vmatpush3.bf16.msra.mxu1 %v530_v0  ;;  %v630_v4 = vld [vmem:[%s716_s0] sm:$0xff]  }
   0x4   :  { %490 = vmatprep.subr.bf16.mxu0 %v531_v1  ;;  %513 = vmatprep.subr.bf16.mxu1 %v531_v1 }
   0x7   :  { %491 = vmatpush3.bf16.msra.mxu0 %v531_v1  ;;  %521 = vmatpush3.bf16.msra.mxu1 %v531_v1 }
   0x8   :  { %492 = vmatprep.subr.bf16.mxu0 %v532_v2  ;;  %514 = vmatprep.subr.bf16.mxu1 %v532_v2 }
   0x9   :  { %9 = vsyncpa [#allocation3], 0  ;;  %v534_v6 = vld [vmem:[%s718_s2 + $0x18] sm:$0xff]   ;;  %504 = vmatprep.mubr.bf16.mxu0 %v630_v4  ;;  %508 = vmatprep.mubr.bf16.mxu1 %v635_v5  ;;  %v535_v7 = vld [vmem:[%s718_s2 + $0x10] sm:$0xff]   ;;  %v588_v12 = vmov 1966171168   ;;  %v193_v14 = vlaneseq }
   0xa   :  { %v536_v8 = vld [vmem:[%s718_s2 + $0x8] sm:$0xff]   ;;  %v537_v9 = vld [vmem:[%s718_s2] sm:$0xff]   ;;  %v659_v11 = vld [vmem:[%s716_s0 + $0x18] sm:$0xff]   ;;  %v191_v13 = vunpack.c.l.s4 %v588_v12  ;;  %vm257_vm0 = vcmask 523264   ;;  %vm302_vm1 = vcmask 130112   ;;  %vm331_vm2 = vcmask 1041409  }
   0xb   :  { %493 = vmatpush3.bf16.msra.mxu0 %v532_v2  ;;  %522 = vmatpush3.bf16.msra.mxu1 %v532_v2  ;;  %v654_v10 = vld [vmem:[%s716_s0 + $0x8] sm:$0xff]   ;;  %v664_v16 = vshrl.u32 %v193_v14, 7  ;;  %v474_v17 = vld.sshfl [vmem:[%s717_s1] sm:$0x33 pattern:$0x75316420] }
   0xc   :  { %494 = vmatprep.subr.bf16.mxu0 %v533_v3  ;;  %515 = vmatprep.subr.bf16.mxu1 %v533_v3  ;;  %v192_v15 = vunpack.c.0.s8 %v191_v13  ;;  %v189_v18 = vcombine.high %v474_v17, %v474_v17  ;;  %v475_v45 = vld [vmem:[%s719_s3] ss:$0 sm:$0xff]  ;;  %vm333_vm3 = vcmask 1042434   ;;  %vm335_vm4 = vcmask 1043459   ;;  %s589_s3 = smov [#allocation2]  }
   0xd   :  { %v671_v22 = vsub.s32 0, %v664_v16  ;;  %vm339_vm6 = vcmask 125952   ;;  %s454_s14 = sshll.u32 %s589_s3, 4  ;;  %s455_s14 = int_to_ptr.vmem [resolvable:$true] %s454_s14 }
   0xe   :  { %v195_v19 = vsub.s32 %v192_v15, %v664_v16  ;;  %s566_s15 = scalar_lea.vmem %s455_s14, 64  ;;  %p571_p1 = scmp.lt.s32.totalorder %s455_s14, %s455_s14 }
   0xf   :  { %495 = vmatpush3.bf16.msra.mxu0 %v533_v3  ;;  %523 = vmatpush3.bf16.msra.mxu1 %v533_v3  ;;  %p567_p0 = scmp.ne.s32.totalorder %s455_s14, %s566_s15  ;;  %p572_p2 = scmp.lt.s32.totalorder %s566_s15, %s566_s15 }
  0x10   :  { %496 = vmatprep.subr.bf16.mxu0 %v534_v6  ;;  %516 = vmatprep.subr.bf16.mxu1 %v534_v6  ;;  %v196_v20 = vrot.slane %v474_v17, %v195_v19  ;;  %v203_v21 = vrot.slane %v189_v18, %v195_v19 }
  0x11   :  { %p573_p3 = por %p572_p2, %p571_p1 }
  0x12   :  { %v204_v23 = vcombine.high %v196_v20, %v196_v20  ;;  %v213_v24 = vrot.slane %v203_v21, %v671_v22  ;;  %v205_v25 = vcombine.high %v203_v21, %v203_v21  ;;  %v209_v26 = vrot.slane %v196_v20, %v671_v22 }
  0x13   :  { %497 = vmatpush3.bf16.msra.mxu0 %v534_v6  ;;  %524 = vmatpush3.bf16.msra.mxu1 %v534_v6  ;;  %p574_p4 = pnand %p573_p3, %p567_p0 }
  0x14   :  { %498 = vmatprep.subr.bf16.mxu0 %v535_v7  ;;  %517 = vmatprep.subr.bf16.mxu1 %v535_v7  ;;  %v217_v27 = vrot.slane %v204_v23, %v671_v22  ;;  %v221_v33 = vrot.slane %v205_v25, %v671_v22 }
  0x17   :  { %499 = vmatpush3.bf16.msra.mxu0 %v535_v7  ;;  %525 = vmatpush3.bf16.msra.mxu1 %v535_v7 }
  0x18   :  { %500 = vmatprep.subr.bf16.mxu0 %v536_v8  ;;  %518 = vmatprep.subr.bf16.mxu1 %v536_v8 }
  0x1b   :  { %501 = vmatpush3.bf16.msra.mxu0 %v536_v8  ;;  %526 = vmatpush3.bf16.msra.mxu1 %v536_v8  ;;  %v283_v8 = vand.u32 127, %v193_v14 }
  0x1c   :  { %502 = vmatprep.subr.bf16.mxu0 %v537_v9  ;;  %519 = vmatprep.subr.bf16.mxu1 %v537_v9 }
  0x1d   :  { %v297_v12 = vadd.s32 4294967288, %v283_v8  ;;  %v295_v19 = vsub.s32 %v283_v8, %v664_v16  ;;  %vm284_vm5 = vcmp.lt.s32.totalorder %v283_v8, 8 }
  0x1f   :  { %503 = vmatpush3.bf16.msra.mxu0 %v537_v9  ;;  %527 = vmatpush3.bf16.msra.mxu1 %v537_v9  ;;  %v300_v17 = vsub.s32 %v297_v12, %v664_v16  ;;  %v401_v12 = vunpack.c.l.bf16 %v659_v11 }
  0x22   :  { %505 = vmatmul.mubr.bf16.vlgmr.msra.gmra.mxu0 %v654_v10  ;;  %509 = vmatmul.mubr.bf16.vlgmr.msra.gmra.mxu1 %v659_v11 }
  0xe2   :  { %v506_v28 = vpop.f32.mrf.mxu0  ;;  %v510_v29 = vpop.f32.mrf.mxu1 }
  0xe3   :  { %v228_v30 = vadd.f32 %v506_v28, %v213_v24  ;;  %v232_v44 = vadd.f32 %v510_v29, %v221_v33 }
  0xe4   :  { %v149_v31 = vpop.f32.mrf.mxu0  ;;  %v165_v32 = vpop.f32.mrf.mxu1 }
  0xe5   :  { %546 = vtanh.f32 %v228_v30  ;;  %v226_v34 = vadd.f32 %v209_v26, %v149_v31  ;;  %v230_v35 = vadd.f32 %v217_v27, %v165_v32 }
  0xe6   :  { %v507_v36 = vpop.f32.mrf.mxu0  ;;  %v511_v37 = vpop.f32.mrf.mxu1 }
  0xe7   :  { %548 = vtanh.f32 %v226_v34  ;;  %v229_v38 = vadd.f32 %v507_v36, %v213_v24  ;;  %v233_v41 = vadd.f32 %v511_v37, %v221_v33 }
  0xe8   :  { %550 = vtanh.f32 %v230_v35  ;;  %v152_v39 = vpop.f32.mrf.mxu0  ;;  %v168_v40 = vpop.f32.mrf.mxu1 }
  0xe9   :  { %552 = vtanh.f32 %v229_v38  ;;  %v227_v42 = vadd.f32 %v209_v26, %v152_v39  ;;  %v231_v43 = vadd.f32 %v217_v27, %v168_v40 }
  0xeb   :  { %554 = vtanh.f32 %v227_v42 }
  0xec   :  { %556 = vtanh.f32 %v231_v43 }
  0xed   :  { %558 = vtanh.f32 %v233_v41 }
  0xee   :  { %560 = vtanh.f32 %v232_v44 }
  0xf2   :  { %v547_v46 = vpop.eup %546 }
  0xf3   :  { %v251_v47 = vmul.f32 %v547_v46, %v475_v45 }
  0xf4   :  { %v549_v48 = vpop.eup %548 }
  0xf5   :  { %v551_v49 = vpop.eup %550  ;;  %v264_v50 = vsel %vm257_vm0, %v251_v47, 0.0  ;;  %v249_v51 = vmul.f32 %v549_v48, %v475_v45 }
  0xf6   :  { %v553_v52 = vpop.eup %552  ;;  %265 = vadd.xlane.f32.xlu1 %v264_v50  ;;  %v253_v55 = vmul.f32 %v551_v49, %v475_v45  ;;  %v364_v50 = vsub.s32 1, %v664_v16 }
  0xf7   :  { %v258_v53 = vsel %vm257_vm0, %v249_v51, 0.0  ;;  %v252_v54 = vmul.f32 %v553_v52, %v475_v45  ;;  %v375_v51 = vsub.s32 2, %v664_v16 }
  0xf8   :  { %v555_v56 = vpop.eup %554  ;;  %259 = vadd.xlane.f32.xlu0 %v258_v53  ;;  %v270_v61 = vsel %vm257_vm0, %v253_v55, 0.0 }
  0xf9   :  { %v557_v57 = vpop.eup %556  ;;  %v267_v58 = vsel %vm257_vm0, %v252_v54, 0.0  ;;  %v250_v62 = vmul.f32 %v555_v56, %v475_v45  ;;  %v386_v54 = vsub.s32 3, %v664_v16  ;;  %v395_v56 = vunpack.c.l.bf16 %v630_v4 }
  0xfa   :  { %v559_v59 = vpop.eup %558  ;;  %268 = vadd.xlane.f32.xlu1 %v267_v58  ;;  %v254_v60 = vmul.f32 %v557_v57, %v475_v45  ;;  %v398_v16 = vunpack.c.h.bf16 %v654_v10 }
  0xfb   :  { %v561_v63 = vpop.eup %560  ;;  %v256_v1 = vmul.f32 %v559_v59, %v475_v45  ;;  %v261_v2 = vsel %vm257_vm0, %v250_v62, 0.0 }
  0xfc   :  { %271 = vadd.xlane.f32.xlu0 %v270_v61  ;;  %v273_v0 = vsel %vm257_vm0, %v254_v60, 0.0  ;;  %v255_v3 = vmul.f32 %v561_v63, %v475_v45  ;;  %v397_v63 = vunpack.c.l.bf16 %v654_v10 }
  0xfd   :  { %v279_v6 = vsel %vm257_vm0, %v256_v1, 0.0 }
  0xfe   :  { %274 = vadd.xlane.f32.xlu1 %v273_v0  ;;  %v276_v7 = vsel %vm257_vm0, %v255_v3, 0.0  ;;  %v399_v3 = vunpack.c.l.bf16 %v635_v5 }
 0x100   :  { %262 = vadd.xlane.f32.xlu0 %v261_v2 }
 0x102   :  { %280 = vadd.xlane.f32.xlu1 %v279_v6  ;;  %v400_v6 = vunpack.c.h.bf16 %v635_v5 }
 0x104   :  { %277 = vadd.xlane.f32.xlu0 %v276_v7 }
 0x17f   :  { %v266_v9 = vpop.xlane.xlu1 %265 }
 0x180   :  { %v307_v24 = vrot.slane %v266_v9, %v295_v19 }
 0x181   :  { %v260_v13 = vpop.xlane.xlu0 %259 }
 0x182   :  { %v296_v25 = vrot.slane %v260_v13, %v295_v19 }
 0x183   :  { %v269_v15 = vpop.xlane.xlu1 %268 }
 0x184   :  { %v311_v21 = vrot.slane %v269_v15, %v300_v17 }
 0x185   :  { %v272_v18 = vpop.xlane.xlu0 %271 }
 0x186   :  { %v312_v14 = vsel %vm302_vm1, %v311_v21, %v307_v24  ;;  %v316_v30 = vrot.slane %v272_v18, %v295_v19 }
 0x187   :  { %v275_v20 = vpop.xlane.xlu1 %274 }
 0x188   :  { %v320_v27 = vrot.slane %v275_v20, %v300_v17 }
 0x189   :  { %v263_v23 = vpop.xlane.xlu0 %262 }
 0x18a   :  { %v301_v26 = vrot.slane %v263_v23, %v300_v17  ;;  %v321_v35 = vsel %vm302_vm1, %v320_v27, %v316_v30 }
 0x18b   :  { %v281_v28 = vpop.xlane.xlu1 %280 }
 0x18c   :  { %v303_v29 = vsel %vm302_vm1, %v301_v26, %v296_v25  ;;  %v329_v33 = vrot.slane %v281_v28, %v300_v17 }
 0x18d   :  { %v278_v31 = vpop.xlane.xlu0 %277  ;;  %v332_v32 = vsel %vm331_vm2, %v312_v14, %v303_v29 }
 0x18e   :  { %v325_v34 = vrot.slane %v278_v31, %v295_v19  ;;  %v334_v37 = vsel %vm333_vm3, %v321_v35, %v332_v32  ;;  %v402_v19 = vunpack.c.h.bf16 %v659_v11 }
 0x190   :  { %v330_v36 = vsel %vm302_vm1, %v329_v33, %v325_v34 }
 0x191   :  { %v336_v38 = vsel %vm335_vm4, %v330_v36, %v334_v37 }
 0x192   :  { %v338_v39 = vsel %vm284_vm5, %v336_v38, -1e+30 }
 0x193   :  { %v340_v40 = vsel %vm339_vm6, %v338_v39, -inf }
 0x194   :  { %341 = vmax.xlane.f32.xlu0 %v340_v40 }
 0x21d   :  { %v342_v41 = vpop.xlane.xlu0 %341 }
 0x21e   :  { %v343_v42 = vsub.f32 %v338_v39, %v342_v41 }
 0x220   :  { %v344_v43 = vmul.f32 1.442695, %v343_v42 }
 0x222   :  { %562 = vpow2.f32 %v344_v43 }
 0x22f   :  { %v563_v44 = vpop.eup %562 }
 0x230   :  { %v346_v45 = vsel %vm339_vm6, %v563_v44, 0.0 }
 0x231   :  { %347 = vadd.xlane.f32.xlu1 %v346_v45 }
 0x2ba   :  { %v348_v46 = vpop.xlane.xlu1 %347 }
 0x2bb   :  { %564 = vrcp.f32 %v348_v46 }
 0x2c8   :  { %v565_v47 = vpop.eup %564 }
 0x2c9   :  { %v350_v48 = vmul.f32 %v565_v47, %v563_v44 }
 0x2cb   :  { %v354_v49 = vrot.slane %v350_v48, %v671_v22  ;;  %v365_v52 = vrot.slane %v350_v48, %v364_v50  ;;  %v376_v53 = vrot.slane %v350_v48, %v375_v51  ;;  %v387_v55 = vrot.slane %v350_v48, %v386_v54 }
 0x2cc   :  { %v396_v22 = vunpack.c.h.bf16 %v630_v4 }
 0x2cd   :  { %360 = vbcast.lane.b32.xlu1 %v354_v49, 264  ;;  %356 = vbcast.lane.b32.xlu0 %v354_v49, 256 }
 0x2d1   :  { %367 = vbcast.lane.b32.xlu1 %v365_v52, 256  ;;  %378 = vbcast.lane.b32.xlu0 %v376_v53, 256 }
 0x2d5   :  { %371 = vbcast.lane.b32.xlu1 %v365_v52, 264  ;;  %389 = vbcast.lane.b32.xlu0 %v387_v55, 256 }
 0x2d9   :  { %382 = vbcast.lane.b32.xlu1 %v376_v53, 264 }
 0x2dd   :  { %393 = vbcast.lane.b32.xlu1 %v387_v55, 264 }
 0x33f   :  { %v361_v57 = vpop.permute.xlu1 %360  ;;  %v357_v58 = vpop.permute.xlu0 %356 }
 0x340   :  { %v404_v59 = vmul.f32 %v396_v22, %v361_v57  ;;  %v403_v60 = vmul.f32 %v395_v56, %v357_v58 }
 0x342   :  { %v411_v61 = vadd.f32 %v404_v59, %v403_v60 }
 0x343   :  { %v368_v62 = vpop.permute.xlu1 %367  ;;  %v379_v1 = vpop.permute.xlu0 %378 }
 0x344   :  { %v412_v0 = vrot.slane %v411_v61, 4  ;;  %v405_v7 = vmul.f32 %v397_v63, %v368_v62  ;;  %v407_v15 = vmul.f32 %v399_v3, %v379_v1 }
 0x346   :  { %v413_v4 = vadd.f32 %v412_v0, %v411_v61 }
 0x347   :  { %v372_v2 = vpop.permute.xlu1 %371  ;;  %v390_v20 = vpop.permute.xlu0 %389 }
 0x348   :  { %v406_v8 = vmul.f32 %v398_v16, %v372_v2  ;;  %v414_v10 = vrot.slane %v413_v4, 2  ;;  %v409_v26 = vmul.f32 %v401_v12, %v390_v20 }
 0x34a   :  { %v418_v9 = vadd.f32 %v406_v8, %v405_v7  ;;  %v415_v28 = vadd.f32 %v414_v10, %v413_v4 }
 0x34b   :  { %v383_v13 = vpop.permute.xlu1 %382 }
 0x34c   :  { %v419_v17 = vrot.slane %v418_v9, 4  ;;  %v408_v18 = vmul.f32 %v400_v6, %v383_v13  ;;  %v416_v34 = vrot.slane %v415_v28, 1 }
 0x34e   :  { %v420_v21 = vadd.f32 %v419_v17, %v418_v9  ;;  %v425_v23 = vadd.f32 %v408_v18, %v407_v15  ;;  %v417_v39 = vadd.f32 %v416_v34, %v415_v28 }
 0x34f   :  { %v394_v24 = vpop.permute.xlu1 %393 }
 0x350   :  { %v421_v25 = vrot.slane %v420_v21, 2  ;;  %v426_v5 = vrot.slane %v425_v23, 4  ;;  %v410_v27 = vmul.f32 %v402_v19, %v394_v24 }
 0x352   :  { %v422_v14 = vadd.f32 %v421_v25, %v420_v21  ;;  %v427_v29 = vadd.f32 %v426_v5, %v425_v23  ;;  %v432_v30 = vadd.f32 %v410_v27, %v409_v26 }
 0x354   :  { %v423_v31 = vrot.slane %v422_v14, 1  ;;  %v428_v32 = vrot.slane %v427_v29, 2  ;;  %v433_v33 = vrot.slane %v432_v30, 4 }
 0x356   :  { %v429_v35 = vadd.f32 %v428_v32, %v427_v29  ;;  %v434_v36 = vadd.f32 %v433_v33, %v432_v30  ;;  %v424_v11 = vadd.f32 %v423_v31, %v422_v14 }
 0x358   :  { %v430_v37 = vrot.slane %v429_v35, 1  ;;  %v435_v38 = vrot.slane %v434_v36, 2  ;;  %v443_v42 = vsel %vm331_vm2, %v424_v11, %v417_v39 }
 0x35a   :  { %v431_v40 = vadd.f32 %v430_v37, %v429_v35  ;;  %v436_v41 = vadd.f32 %v435_v38, %v434_v36 }
 0x35c   :  { %v437_v43 = vrot.slane %v436_v41, 1  ;;  %v444_v44 = vsel %vm333_vm3, %v431_v40, %v443_v42 }
 0x35e   :  { %v438_v45 = vadd.f32 %v437_v43, %v436_v41 }
 0x360   :  { %v445_v46 = vsel %vm335_vm4, %v438_v45, %v444_v44 }
 0x361   :  { %447 = vst [vmem:[#allocation2] sm:$0xf] %v445_v46 }
 0x362   :  { %577 = shalt.err (!%p574_p4)
}
 0x363   :  { %457 = dma.vmem_to_hbm [thread:$0]  %s455_s14, 64, %s720_s4, [#allocation3]  }
 0x364   :  { %586 = dma.done.wait [#allocation3], 64  }
 0x365   :  { %587 = vsyncadd [#allocation3], 4294967232 }
 0x366   :  { %461 = vsyncpa [#allocation3], 1 }

</bundles_post_ra>
